<compile_context>
chip_gen: v7x
topology: tpu7x:2x2x1
jax: 0.10.0
libtpu: 0.0.40
codegen_flags: <defaults>
</compile_context>

<pallas_src>
import functools
import math

import jax
import jax.numpy as jnp
from jax import lax
from jax.experimental import pallas as pl
from jax.experimental.pallas import tpu as pltpu


_MIB = 1024 * 1024


def _round_up(a, b):
    return ((a + b - 1) // b) * b


def _ln_epilogue(s, ev, od, colsum, bias, eps, inv_n):
    """LayerNorm-around-the-matmul epilogue.

    s      : (m, c_out) f32  = ev @ W_ev + od @ W_od   (gamma already folded in W)
    ev, od : (m, 2C)          activation-dtype channel halves ([x0|x2] / [x1|x3])
    colsum : (1, c_out) f32   column sums of [W_ev; W_od]
    bias   : (1, c_out) f32   beta @ W^T
    Returns (m, c_out) f32 == LayerNorm([x0|x1|x2|x3]; gamma, beta) @ W^T.
    """
    ev32 = ev.astype(jnp.float32)
    od32 = od.astype(jnp.float32)
    ssum = (jnp.sum(ev32, axis=-1, keepdims=True)
            + jnp.sum(od32, axis=-1, keepdims=True))
    ssq = (jnp.sum(ev32 * ev32, axis=-1, keepdims=True)
           + jnp.sum(od32 * od32, axis=-1, keepdims=True))
    mean = ssum * inv_n
    var = jnp.maximum(ssq * inv_n - mean * mean, 0.0)   # single-pass, clamped
    inv = lax.rsqrt(var + eps)
    return (s - mean * colsum) * inv + bias


def _merge_kernel_flat(x_ref, wt_ref, wb_ref, cb_ref, o_ref, *, eps, inv_n):
    """Fused path when wh is a multiple of the dtype's sublane packing.

    x_ref: (tr, 2, wh, 2C) un-merged row-pairs; the flatten below is
    layout-preserving (free), so the MXU sees one big (tr*wh, 2C) operand.
    """
    tr, _, wh, c2 = x_ref.shape
    m = tr * wh
    ev = x_ref[:, 0, :, :].reshape(m, c2)   # even image rows -> [x0 | x2]
    od = x_ref[:, 1, :, :].reshape(m, c2)   # odd  image rows -> [x1 | x3]
    s = jnp.dot(ev, wt_ref[...], preferred_element_type=jnp.float32)
    s = s + jnp.dot(od, wb_ref[...], preferred_element_type=jnp.float32)
    y = _ln_epilogue(s, ev, od, cb_ref[0:1, :], cb_ref[1:2, :], eps, inv_n)
    o_ref[...] = y.astype(o_ref.dtype)


def _merge_kernel_loop(x_ref, wt_ref, wb_ref, cb_ref, o_ref, *, eps, inv_n):
    """Fused path for arbitrary wh (Swin: 28/14/7): loop over row-pairs with 2-D
    matmuls and leading-index stores -- no value reshapes / relayouts needed, and
    still no merged tensor in HBM."""
    tr = x_ref.shape[0]
    wt = wt_ref[...]
    wb = wb_ref[...]
    colsum = cb_ref[0:1, :]
    bias = cb_ref[1:2, :]

    def body(t, carry):
        ev = x_ref[t, 0]                    # (wh, 2C)  even image row
        od = x_ref[t, 1]                    # (wh, 2C)  odd  image row
        s = jnp.dot(ev, wt, preferred_element_type=jnp.float32)
        s = s + jnp.dot(od, wb, preferred_element_type=jnp.float32)
        y = _ln_epilogue(s, ev, od, colsum, bias, eps, inv_n)
        o_ref[t] = y.astype(o_ref.dtype)
        return carry

    lax.fori_loop(0, tr, body, 0)


def patch_merging(x, H, W, gamma, beta, weight, *, eps=1e-5, target_rows=2048):
    """Swin PatchMerging forward.

    x: (B, H*W, C); weight: (2C, 4C) PyTorch nn.Linear layout (y = xn @ W^T);
    gamma/beta: (4C,) LayerNorm affine.  Returns (B, H/2*W/2, 2C), dtype of x.
    """
    B, L, C = x.shape
    assert L == H * W, "input feature has wrong size"
    assert H % 2 == 0 and W % 2 == 0, f"x size ({H}*{W}) are not even."

    wh = W // 2
    R = B * (H // 2)                 # image row-pairs
    rows = R * wh                    # merged output rows
    c2 = 2 * C
    c_out = 2 * C
    n4 = 4 * C

    f32 = jnp.float32
    isz = jnp.dtype(x.dtype).itemsize
    mm_dtype = x.dtype               # MXU operands stay in the activation dtype
    w_isz = jnp.dtype(mm_dtype).itemsize

    # ---- fold LayerNorm affine + reduction weight (wrapper-side, tiny) --------
    wt_full = weight.T.astype(f32)                         # (4C, 2C)
    wg = gamma.astype(f32)[:, None] * wt_full              # gamma folded into W
    # LayerNorm stats are permutation-invariant over 4C, so regroup the weight
    # rows into the channel order the kernel gets for free:
    #   even image row -> [x0 | x2],  odd image row -> [x1 | x3]
    w_ev = jnp.concatenate([wg[0:C], wg[2 * C:3 * C]], axis=0).astype(mm_dtype)
    w_od = jnp.concatenate([wg[C:2 * C], wg[3 * C:4 * C]], axis=0).astype(mm_dtype)
    colsum = (jnp.sum(w_ev.astype(f32), axis=0)
              + jnp.sum(w_od.astype(f32), axis=0))[None, :]          # (1, 2C)
    bias = beta.astype(f32)[None, :] @ wt_full                       # (1, 2C)
    cb = jnp.concatenate([colsum, bias], axis=0)                     # (2, 2C) f32

    # ---- in-kernel strategy (dtype-aware sublane packing) ----------------------
    sub = max(8, 32 // isz)          # 8 for f32, 16 for bf16, 32 for int8/fp8
    use_flat = (wh % sub) == 0       # flatten (tr,wh,2C)->(tr*wh,2C) is free

    xv = x.reshape(R, 2, wh, c2)     # free, layout-preserving view of x

    # ---- pick the row-pair tile (tr) -------------------------------------------
    tr = max(1, min(R, target_rows // max(wh, 1)))
    if R >= 4:
        tr = min(tr, pl.cdiv(R, 4))  # >= 4 grid steps: both v7x TCs get work
    elif R >= 2:
        tr = min(tr, pl.cdiv(R, 2))

    lane = lambda n: _round_up(n, 128)

    def vmem_need(tr_):
        m = tr_ * wh
        in_blk = tr_ * 2 * _round_up(wh, sub) * lane(c2) * isz
        if use_flat:
            out_blk = _round_up(m, sub) * lane(c_out) * isz
            tmp_rows = m                         # temporaries are tile-wide
        else:
            out_blk = tr_ * _round_up(wh, sub) * lane(c_out) * isz
            tmp_rows = _round_up(wh, sub)        # temporaries are per row-pair
        # f32 stat copies of ev/od, f32 matmul accumulator + epilogue temps,
        # plus possible activation-dtype copies of ev/od.
        temps = tmp_rows * (lane(c2) * (8 + 2 * isz) + 8 * lane(c_out))
        w_blk = 2 * 2 * _round_up(c2, sub) * lane(c_out) * w_isz   # 2 weights, 2 bufs
        cb_blk = 2 * 8 * lane(c_out) * 4
        return 2 * (in_blk + out_blk) + w_blk + cb_blk + temps + _MIB

    # generation-aware VMEM budget (128 MiB on v5e/v6e, 64 MiB per TC on v7x)
    try:
        vmem_cap = int(pltpu.get_tpu_info().vmem_capacity_bytes)
    except Exception:
        vmem_cap = 64 * _MIB
    budget = max(24 * _MIB, min(vmem_cap // 2, 96 * _MIB))
    while tr > 1 and vmem_need(tr) > budget:
        tr = max(1, tr // 2)
    vmem_limit = int(min(vmem_cap - 8 * _MIB,
                         max(32 * _MIB, vmem_need(tr) + 8 * _MIB)))

    grid = (pl.cdiv(R, tr),)         # masked last tile if ragged
    in_specs = [
        pl.BlockSpec((tr, 2, wh, c2), lambda i: (i, 0, 0, 0)),
        # Constant-index weight/bias blocks: fetched once, kept resident.
        pl.BlockSpec((c2, c_out), lambda i: (0, 0)),
        pl.BlockSpec((c2, c_out), lambda i: (0, 0)),
        pl.BlockSpec((2, c_out), lambda i: (0, 0)),
    ]
    cost = pl.CostEstimate(
        flops=int(4 * rows * c2 * c_out + 12 * rows * c2),
        transcendentals=int(rows),
        bytes_accessed=int(rows * (2 * c2 + c_out) * isz
                           + 2 * c2 * c_out * w_isz + 2 * c_out * 4),
    )
    cparams = pltpu.CompilerParams(dimension_semantics=("parallel",),
                                   vmem_limit_bytes=vmem_limit)

    if use_flat:
        out2d = pl.pallas_call(
            functools.partial(_merge_kernel_flat, eps=eps, inv_n=1.0 / n4),
            out_shape=jax.ShapeDtypeStruct((rows, c_out), x.dtype),
            grid=grid,
            in_specs=in_specs,
            out_specs=pl.BlockSpec((tr * wh, c_out), lambda i: (i, 0)),
            compiler_params=cparams,
            cost_estimate=cost,
        )(xv, w_ev, w_od, cb)
        return out2d.reshape(B, (H // 2) * wh, c_out)
    else:
        out3d = pl.pallas_call(
            functools.partial(_merge_kernel_loop, eps=eps, inv_n=1.0 / n4),
            out_shape=jax.ShapeDtypeStruct((R, wh, c_out), x.dtype),
            grid=grid,
            in_specs=in_specs,
            out_specs=pl.BlockSpec((tr, wh, c_out), lambda i: (i, 0, 0)),
            compiler_params=cparams,
            cost_estimate=cost,
        )(xv, w_ev, w_od, cb)
        return out3d.reshape(B, (H // 2) * wh, c_out)


def _reference(x, H, W, gamma, beta, weight, eps=1e-5):
    B, L, C = x.shape
    xr = x.astype(jnp.float32).reshape(B, H, W, C)
    x0 = xr[:, 0::2, 0::2, :]
    x1 = xr[:, 1::2, 0::2, :]
    x2 = xr[:, 0::2, 1::2, :]
    x3 = xr[:, 1::2, 1::2, :]
    xm = jnp.concatenate([x0, x1, x2, x3], -1).reshape(B, -1, 4 * C)
    mean = jnp.mean(xm, axis=-1, keepdims=True)
    var = jnp.mean((xm - mean) ** 2, axis=-1, keepdims=True)
    xn = (xm - mean) / jnp.sqrt(var + eps) * gamma.astype(jnp.float32) \
        + beta.astype(jnp.float32)
    return jnp.einsum("blk,ok->blo", xn, weight.astype(jnp.float32))


if __name__ == "__main__":
    key = jax.random.PRNGKey(0)
    kx, kw, kg, kb = jax.random.split(key, 4)

    def run_case(name, B, C, H, W, dtype, atol, rtol):
        x = jax.random.normal(kx, (B, H * W, C), dtype=jnp.float32)
        weight = jax.random.normal(kw, (2 * C, 4 * C), dtype=jnp.float32) * 0.02
        gamma = 1.0 + 0.1 * jax.random.normal(kg, (4 * C,), dtype=jnp.float32)
        beta = 0.1 * jax.random.normal(kb, (4 * C,), dtype=jnp.float32)
        out = jax.block_until_ready(
            patch_merging(x.astype(dtype), H, W, gamma.astype(dtype),
                          beta.astype(dtype), weight.astype(dtype)))
        ref = _reference(x, H, W, gamma, beta, weight)
        assert out.shape == (B, (H // 2) * (W // 2), 2 * C), (name, out.shape)
        err = float(jnp.max(jnp.abs(out.astype(jnp.float32) - ref)))
        assert jnp.allclose(out.astype(jnp.float32), ref,
                            atol=atol, rtol=rtol), (name, err)

    # flat path, f32 (wh = 8, aligned)
    run_case("f32_flat", 2, 4, 16, 16, jnp.float32, 2e-4, 2e-4)
    # loop path, bf16 (wh = 8 is not a multiple of the 16-row bf16 packing)
    run_case("bf16_loop", 2, 4, 16, 16, jnp.bfloat16, 5e-2, 5e-2)
    # flat path, bf16 (wh = 16, aligned for bf16)
    run_case("bf16_flat", 2, 4, 16, 32, jnp.bfloat16, 5e-2, 5e-2)
    # loop path, f32, Swin-like misaligned wh (wh = 6) and odd channel count
    run_case("f32_loop_misaligned", 1, 3, 12, 12, jnp.float32, 2e-4, 2e-4)

    print("KERNEL_OK")
</pallas_src>

<mosaic_0001>
module attributes {stable_mosaic.version = 11 : i64} {
  func.func @_merge_kernel_flat(%arg0: i32, %arg1: memref<4x2x8x8xf32, #tpu.memory_space<vmem>>, %arg2: memref<8x8xf32, #tpu.memory_space<vmem>>, %arg3: memref<8x8xf32, #tpu.memory_space<vmem>>, %arg4: memref<2x8xf32, #tpu.memory_space<vmem>>, %arg5: memref<32x8xf32, #tpu.memory_space<vmem>>) attributes {dimension_semantics = [#tpu.dimension_semantics<parallel>], iteration_bounds = array<i64: 4>, scalar_prefetch = 0 : i64, scratch_operands = 0 : i64, tpu.core_type = #tpu.core_type<tc>, window_params = [{transform_indices = @transform_0, window_bounds = array<i64: 4, 2, 8, 8>}, {pipeline_mode = #tpu.pipeline_mode<synchronous>, transform_indices = @transform_1, window_bounds = array<i64: 8, 8>}, {pipeline_mode = #tpu.pipeline_mode<synchronous>, transform_indices = @transform_2, window_bounds = array<i64: 8, 8>}, {pipeline_mode = #tpu.pipeline_mode<synchronous>, transform_indices = @transform_3, window_bounds = array<i64: 2, 8>}, {transform_indices = @transform_4, window_bounds = array<i64: 32, 8>}]} {
    %c0 = arith.constant 0 : index
    %c0_0 = arith.constant 0 : index
    %c0_1 = arith.constant 0 : index
    %c0_2 = arith.constant 0 : index
    %0 = vector.load %arg1[%c0, %c0_0, %c0_1, %c0_2] : memref<4x2x8x8xf32, #tpu.memory_space<vmem>>, vector<4x1x8x8xf32>
    %1 = vector.shape_cast %0 : vector<4x1x8x8xf32> to vector<4x8x8xf32>
    %2 = vector.shape_cast %1 : vector<4x8x8xf32> to vector<32x8xf32>
    %c0_3 = arith.constant 0 : index
    %c1 = arith.constant 1 : index
    %c0_4 = arith.constant 0 : index
    %c0_5 = arith.constant 0 : index
    %3 = vector.load %arg1[%c0_3, %c1, %c0_4, %c0_5] : memref<4x2x8x8xf32, #tpu.memory_space<vmem>>, vector<4x1x8x8xf32>
    %4 = vector.shape_cast %3 : vector<4x1x8x8xf32> to vector<4x8x8xf32>
    %5 = vector.shape_cast %4 : vector<4x8x8xf32> to vector<32x8xf32>
    %c0_6 = arith.constant 0 : index
    %c0_7 = arith.constant 0 : index
    %6 = vector.load %arg2[%c0_6, %c0_7] : memref<8x8xf32, #tpu.memory_space<vmem>>, vector<8x8xf32>
    %cst = arith.constant dense<0.000000e+00> : vector<32x8xf32>
    %7 = tpu.matmul %2, %6, %cst {dimension_numbers = #tpu.dot_dimension_numbers<[1], [0], [0], [1], [0, 0, 1, 1], [], []>} : vector<32x8xf32>, vector<8x8xf32>, vector<32x8xf32> -> vector<32x8xf32>
    %c0_8 = arith.constant 0 : index
    %c0_9 = arith.constant 0 : index
    %8 = vector.load %arg3[%c0_8, %c0_9] : memref<8x8xf32, #tpu.memory_space<vmem>>, vector<8x8xf32>
    %cst_10 = arith.constant dense<0.000000e+00> : vector<32x8xf32>
    %9 = tpu.matmul %5, %8, %cst_10 {dimension_numbers = #tpu.dot_dimension_numbers<[1], [0], [0], [1], [0, 0, 1, 1], [], []>} : vector<32x8xf32>, vector<8x8xf32>, vector<32x8xf32> -> vector<32x8xf32>
    %10 = arith.addf %7, %9 : vector<32x8xf32>
    %c0_11 = arith.constant 0 : index
    %c0_12 = arith.constant 0 : index
    %11 = vector.load %arg4[%c0_11, %c0_12] : memref<2x8xf32, #tpu.memory_space<vmem>>, vector<1x8xf32>
    %c1_13 = arith.constant 1 : index
    %c0_14 = arith.constant 0 : index
    %12 = vector.load %arg4[%c1_13, %c0_14] : memref<2x8xf32, #tpu.memory_space<vmem>>, vector<1x8xf32>
    %cst_15 = arith.constant dense<0.000000e+00> : vector<32xf32>
    %13 = vector.multi_reduction <add>, %2, %cst_15 [1] : vector<32x8xf32> to vector<32xf32>
    %14 = vector.shape_cast %13 : vector<32xf32> to vector<32x1xf32>
    %cst_16 = arith.constant dense<0.000000e+00> : vector<32xf32>
    %15 = vector.multi_reduction <add>, %5, %cst_16 [1] : vector<32x8xf32> to vector<32xf32>
    %16 = vector.shape_cast %15 : vector<32xf32> to vector<32x1xf32>
    %17 = arith.addf %14, %16 : vector<32x1xf32>
    %18 = arith.mulf %2, %2 : vector<32x8xf32>
    %cst_17 = arith.constant dense<0.000000e+00> : vector<32xf32>
    %19 = vector.multi_reduction <add>, %18, %cst_17 [1] : vector<32x8xf32> to vector<32xf32>
    %20 = vector.shape_cast %19 : vector<32xf32> to vector<32x1xf32>
    %21 = arith.mulf %5, %5 : vector<32x8xf32>
    %cst_18 = arith.constant dense<0.000000e+00> : vector<32xf32>
    %22 = vector.multi_reduction <add>, %21, %cst_18 [1] : vector<32x8xf32> to vector<32xf32>
    %23 = vector.shape_cast %22 : vector<32xf32> to vector<32x1xf32>
    %24 = arith.addf %20, %23 : vector<32x1xf32>
    %cst_19 = arith.constant 6.250000e-02 : f32
    %25 = vector.broadcast %cst_19 : f32 to vector<32x1xf32>
    %26 = arith.mulf %17, %25 : vector<32x1xf32>
    %cst_20 = arith.constant 6.250000e-02 : f32
    %27 = vector.broadcast %cst_20 : f32 to vector<32x1xf32>
    %28 = arith.mulf %24, %27 : vector<32x1xf32>
    %29 = arith.mulf %26, %26 : vector<32x1xf32>
    %30 = arith.subf %28, %29 : vector<32x1xf32>
    %cst_21 = arith.constant 0.000000e+00 : f32
    %31 = vector.broadcast %cst_21 : f32 to vector<32x1xf32>
    %32 = arith.maximumf %30, %31 : vector<32x1xf32>
    %cst_22 = arith.constant 9.99999974E-6 : f32
    %33 = vector.broadcast %cst_22 : f32 to vector<32x1xf32>
    %34 = arith.addf %32, %33 : vector<32x1xf32>
    %35 = math.rsqrt %34 : vector<32x1xf32>
    %36 = vector.broadcast %26 : vector<32x1xf32> to vector<32x8xf32>
    %37 = vector.broadcast %11 : vector<1x8xf32> to vector<32x8xf32>
    %38 = arith.mulf %36, %37 : vector<32x8xf32>
    %39 = arith.subf %10, %38 : vector<32x8xf32>
    %40 = vector.broadcast %35 : vector<32x1xf32> to vector<32x8xf32>
    %41 = arith.mulf %39, %40 : vector<32x8xf32>
    %42 = vector.broadcast %12 : vector<1x8xf32> to vector<32x8xf32>
    %43 = arith.addf %41, %42 : vector<32x8xf32>
    %c0_23 = arith.constant 0 : index
    %c0_24 = arith.constant 0 : index
    %44 = vector.load %arg5[%c0_23, %c0_24] : memref<32x8xf32, #tpu.memory_space<vmem>>, vector<32x8xf32>
    tpu.vector_store %arg5[%c0_23, %c0_24], %43 {strides = array<i32>} : memref<32x8xf32, #tpu.memory_space<vmem>>, vector<32x8xf32>,
    return
  }
  func.func @transform_0(%arg0: i32) -> (i32, i32, i32, i32) {
    %c0_i32 = arith.constant 0 : i32
    %c0_i32_0 = arith.constant 0 : i32
    %c0_i32_1 = arith.constant 0 : i32
    %c0_i32_2 = arith.constant 0 : i32
    return %arg0, %c0_i32, %c0_i32_0, %c0_i32_1 : i32, i32, i32, i32
  }
  func.func @transform_1(%arg0: i32) -> (i32, i32) {
    %c0_i32 = arith.constant 0 : i32
    %c0_i32_0 = arith.constant 0 : i32
    %c0_i32_1 = arith.constant 0 : i32
    return %c0_i32, %c0_i32_0 : i32, i32
  }
  func.func @transform_2(%arg0: i32) -> (i32, i32) {
    %c0_i32 = arith.constant 0 : i32
    %c0_i32_0 = arith.constant 0 : i32
    %c0_i32_1 = arith.constant 0 : i32
    return %c0_i32, %c0_i32_0 : i32, i32
  }
  func.func @transform_3(%arg0: i32) -> (i32, i32) {
    %c0_i32 = arith.constant 0 : i32
    %c0_i32_0 = arith.constant 0 : i32
    %c0_i32_1 = arith.constant 0 : i32
    return %c0_i32, %c0_i32_0 : i32, i32
  }
  func.func @transform_4(%arg0: i32) -> (i32, i32) {
    %c0_i32 = arith.constant 0 : i32
    %c0_i32_0 = arith.constant 0 : i32
    return %arg0, %c0_i32 : i32, i32
  }
}

</mosaic_0001>

<bundles_post_ra>
// kernel: tpu_custom_call.1
= control target key start
LH: loop header
LB: loop body
LE: loop exit
PB: predicated region body
PF: predicated region fallthrough
CT: control target
= control target key end

     0   :  { %s694_s15 = smov 0   ;;  %s755_s0 = inlined_call_operand.vmem [shape: f32[16,2,8,8], index: 0, kind: input, shape index: {}]   ;;  %s756_s1 = inlined_call_operand.vmem [shape: f32[8,8], index: 1, kind: input, shape index: {}]   ;;  %s757_s2 = inlined_call_operand.vmem [shape: f32[8,8], index: 2, kind: input, shape index: {}]   ;;  %s758_s3 = inlined_call_operand.vmem [shape: f32[2,8], index: 3, kind: input, shape index: {}]   ;;  %s759_s4 = inlined_call_operand.vmem [shape: f32[128,8], index: 4, kind: output, shape index: {}]  }
   0x1 LB: > { %s588_s16 = sadd.s32 4294967295, %s667_s15   ;;  %p592_p0 = scmp.ge.s32.totalorder %s667_s15, 1  ;;  %s667_s15 = sphi %s694_s15, %s14_s15  }
   0x2   : > { %p164_p1 = scmp.lt.s32.totalorder %s667_s15, 5 }
   0x4   : > { %p165_p2 = pnand %p592_p0, %p164_p1 }
   0x5   : > { %v214_v0 = vld [vmem:[%s757_s2] sm:$0xff] (!%p165_p2)  ;;  %s593_s21 = sshll.u32 (!%p165_p2), %s588_s16, 2  ;;  %vm215_vm0 = vcmask (!%p165_p2), 64512  }
   0x6   : > { %168 = sbr.rel (%p165_p2) target bundleno = 244 (0xf4), region = 36  ;;  %v213_v1 = vld [vmem:[%s756_s1] sm:$0xff] (!%p165_p2)  ;;  %625 = vmatprep.subr.mxu1 (!%p165_p2), %v214_v0  ;;  %p192_p3 = scmp.lt.s32.totalorder (!%p165_p2), %s593_s21, 15 }
   0x7   : > { %633 = vmatprep.subr.mxu0 (!%p165_p2), %v213_v1  ;;  %626 = vmatpush3.msra.mxu1 (!%p165_p2), %v214_v0 }
   0x8   : > { %634 = vmatpush3.msra.mxu0 (!%p165_p2), %v213_v1 }
   0xd   : > { %s761_s21 = smov (!%p192_p3, %s593_s21), 15 }
   0xe   : > { %s614_s22 = sshll.u32 %s761_s21, 4  ;;  %s597_s28 = sshll.u32 %s761_s21, 3 }
   0xf   : > { %s196_s25 = scalar_lea.vmem %s755_s0, %s614_s22  ;;  %s202_s7 = scalar_lea.vmem %s759_s4, %s597_s28 }
  0x10   : > { %v598_v2 = vld [vmem:[%s196_s25 + $0x8] sm:$0xff]  ;;  %v204_v3 = vld [vmem:[%s196_s25] sm:$0xff]  ;;  %v599_v4 = vld [vmem:[%s196_s25 + $0x18] sm:$0xff] }
  0x11   : > { %627 = vmatprep.mubr.msk.f32.mxu1 %vm215_vm0, %v598_v2  ;;  %635 = vmatprep.mubr.msk.f32.mxu0 %vm215_vm0, %v204_v3  ;;  %v205_v5 = vld [vmem:[%s196_s25 + $0x10] sm:$0xff]  ;;  %v600_v6 = vld [vmem:[%s196_s25 + $0x28] sm:$0xff]  ;;  %v206_v7 = vld [vmem:[%s196_s25 + $0x20] sm:$0xff]  ;;  %v412_v8 = vsel %vm215_vm0, %v204_v3, 0.0  ;;  %v424_v14 = vsel %vm215_vm0, %v598_v2, 0.0  ;;  %v427_v15 = vsel %vm215_vm0, %v599_v4, 0.0  ;;  %v440_v18 = vmul.f32 %v204_v3, %v204_v3 }
  0x12   : > { %628 = vmatmul.mubr.msk.f32.vlgmr.msra.gmra.mrb[0].mxu1 %vm215_vm0, %v599_v4  ;;  %636 = vmatmul.mubr.msk.f32.vlgmr.msra.gmra.mrb[0].mxu0 %vm215_vm0, %v205_v5  ;;  %v418_v9 = vsel %vm215_vm0, %v206_v7, 0.0  ;;  %v601_v10 = vld [vmem:[%s196_s25 + $0x38] sm:$0xff]  ;;  %v207_v11 = vld [vmem:[%s196_s25 + $0x30] sm:$0xff]  ;;  %v415_v12 = vsel %vm215_vm0, %v205_v5, 0.0  ;;  %v430_v16 = vsel %vm215_vm0, %v600_v6, 0.0  ;;  %v441_v19 = vmul.f32 %v205_v5, %v205_v5 }
  0x13   : > { %630 = vmatprep.mubr.msk.f32.mxu1 %vm215_vm0, %v600_v6  ;;  %638 = vmatprep.mubr.msk.f32.mxu0 %vm215_vm0, %v206_v7  ;;  %v421_v13 = vsel %vm215_vm0, %v207_v11, 0.0  ;;  %v433_v17 = vsel %vm215_vm0, %v601_v10, 0.0  ;;  %v444_v20 = vsel %vm215_vm0, %v440_v18, 0.0  ;;  %v442_v22 = vmul.f32 %v206_v7, %v206_v7  ;;  %v610_v18 = vld [vmem:[%s758_s3] ss:$0 sm:$0xff] }
  0x14   : > { %413 = vadd.xlane.f32.xlu0 %v412_v8  ;;  %419 = vadd.xlane.f32.xlu1 %v418_v9  ;;  %v447_v21 = vsel %vm215_vm0, %v441_v19, 0.0  ;;  %v443_v23 = vmul.f32 %v207_v11, %v207_v11  ;;  %v456_v26 = vmul.f32 %v598_v2, %v598_v2  ;;  %v457_v27 = vmul.f32 %v599_v4, %v599_v4 }
  0x15   : > { %v450_v24 = vsel %vm215_vm0, %v442_v22, 0.0  ;;  %v458_v30 = vmul.f32 %v600_v6, %v600_v6  ;;  %v459_v31 = vmul.f32 %v601_v10, %v601_v10 }
  0x16   : > { %631 = vmatmul.mubr.msk.f32.gmra.mrb[2].mxu1 %vm215_vm0, %v601_v10  ;;  %639 = vmatmul.mubr.msk.f32.gmra.mrb[2].mxu0 %vm215_vm0, %v207_v11  ;;  %v453_v25 = vsel %vm215_vm0, %v443_v23, 0.0  ;;  %v460_v28 = vsel %vm215_vm0, %v456_v26, 0.0  ;;  %v463_v29 = vsel %vm215_vm0, %v457_v27, 0.0 }
  0x17   : > { %v466_v32 = vsel %vm215_vm0, %v458_v30, 0.0  ;;  %v469_v33 = vsel %vm215_vm0, %v459_v31, 0.0 }
  0x18   : > { %416 = vadd.xlane.f32.xlu0 %v415_v12  ;;  %422 = vadd.xlane.f32.xlu1 %v421_v13 }
  0x1c   : > { %425 = vadd.xlane.f32.xlu0 %v424_v14  ;;  %428 = vadd.xlane.f32.xlu1 %v427_v15 }
  0x20   : > { %431 = vadd.xlane.f32.xlu0 %v430_v16  ;;  %434 = vadd.xlane.f32.xlu1 %v433_v17 }
  0x24   : > { %445 = vadd.xlane.f32.xlu0 %v444_v20  ;;  %448 = vadd.xlane.f32.xlu1 %v447_v21 }
  0x28   : > { %451 = vadd.xlane.f32.xlu0 %v450_v24  ;;  %454 = vadd.xlane.f32.xlu1 %v453_v25 }
  0x2c   : > { %461 = vadd.xlane.f32.xlu0 %v460_v28  ;;  %464 = vadd.xlane.f32.xlu1 %v463_v29  ;;  %v611_v29 = vld [vmem:[%s758_s3 + $0x1] ss:$0 sm:$0xff] }
  0x30   : > { %467 = vadd.xlane.f32.xlu0 %v466_v32  ;;  %470 = vadd.xlane.f32.xlu1 %v469_v33 }
  0xa1   : > { %v420_v34 = vpop.xlane.xlu1 %419  ;;  %v414_v35 = vpop.xlane.xlu0 %413 }
  0xa5   : > { %v423_v36 = vpop.xlane.xlu1 %422  ;;  %v417_v37 = vpop.xlane.xlu0 %416 }
  0xa9   : > { %v429_v38 = vpop.xlane.xlu1 %428  ;;  %v426_v39 = vpop.xlane.xlu0 %425 }
  0xaa   : > { %v437_v47 = vadd.f32 %v429_v38, %v417_v37  ;;  %v436_v49 = vadd.f32 %v426_v39, %v414_v35 }
  0xac   : > { %v477_v50 = vmul.f32 0.0625, %v437_v47  ;;  %v476_v53 = vmul.f32 0.0625, %v436_v49 }
  0xad   : > { %v435_v40 = vpop.xlane.xlu1 %434  ;;  %v432_v41 = vpop.xlane.xlu0 %431 }
  0xae   : > { %v439_v51 = vadd.f32 %v435_v40, %v423_v36  ;;  %v438_v54 = vadd.f32 %v432_v41, %v420_v34  ;;  %v485_v58 = vmul.f32 %v477_v50, %v477_v50  ;;  %v484_v62 = vmul.f32 %v476_v53, %v476_v53 }
  0xaf   : > { %v509_v21 = vmul.f32 %v610_v18, %v477_v50  ;;  %v508_v25 = vmul.f32 %v610_v18, %v476_v53 }
  0xb0   : > { %v479_v59 = vmul.f32 0.0625, %v439_v51  ;;  %v478_v63 = vmul.f32 0.0625, %v438_v54 }
  0xb1   : > { %v449_v42 = vpop.xlane.xlu1 %448  ;;  %v446_v43 = vpop.xlane.xlu0 %445 }
  0xb2   : > { %v487_v2 = vmul.f32 %v479_v59, %v479_v59  ;;  %v486_v5 = vmul.f32 %v478_v63, %v478_v63  ;;  %v511_v34 = vmul.f32 %v610_v18, %v479_v59  ;;  %v510_v39 = vmul.f32 %v610_v18, %v478_v63 }
  0xb5   : > { %v455_v44 = vpop.xlane.xlu1 %454  ;;  %v452_v45 = vpop.xlane.xlu0 %451 }
  0xb9   : > { %v465_v46 = vpop.xlane.xlu1 %464  ;;  %v462_v48 = vpop.xlane.xlu0 %461 }
  0xba   : > { %v473_v52 = vadd.f32 %v465_v46, %v449_v42  ;;  %v472_v55 = vadd.f32 %v462_v48, %v446_v43 }
  0xbc   : > { %v481_v60 = vmul.f32 0.0625, %v473_v52  ;;  %v480_v0 = vmul.f32 0.0625, %v472_v55 }
  0xbd   : > { %v471_v56 = vpop.xlane.xlu1 %470  ;;  %v468_v57 = vpop.xlane.xlu0 %467 }
  0xbe   : > { %v475_v61 = vadd.f32 %v471_v56, %v455_v44  ;;  %v474_v1 = vadd.f32 %v468_v57, %v452_v45  ;;  %v489_v3 = vsub.f32 %v481_v60, %v485_v58  ;;  %v488_v6 = vsub.f32 %v480_v0, %v484_v62 }
  0xc0   : > { %v483_v4 = vmul.f32 0.0625, %v475_v61  ;;  %v482_v7 = vmul.f32 0.0625, %v474_v1  ;;  %v493_v8 = vmax.f32 %v489_v3, 0.0  ;;  %v492_v10 = vmax.f32 %v488_v6, 0.0 }
  0xc2   : > { %v491_v9 = vsub.f32 %v483_v4, %v487_v2  ;;  %v490_v11 = vsub.f32 %v482_v7, %v486_v5  ;;  %v497_v12 = vadd.f32 1e-05, %v493_v8  ;;  %v496_v14 = vadd.f32 1e-05, %v492_v10 }
  0xc4   : > { %v495_v13 = vmax.f32 %v491_v9, 0.0  ;;  %v494_v15 = vmax.f32 %v490_v11, 0.0  ;;  %653 = vrsqrt.f32 %v497_v12 }
  0xc5   : > { %655 = vrsqrt.f32 %v496_v14 }
  0xc6   : > { %v499_v16 = vadd.f32 1e-05, %v495_v13  ;;  %v498_v17 = vadd.f32 1e-05, %v494_v15 }
  0xc8   : > { %657 = vrsqrt.f32 %v499_v16 }
  0xc9   : > { %659 = vrsqrt.f32 %v498_v17 }
  0xce   : > { %v654_v28 = vpop.eup %653 }
  0xcf   : > { %v656_v33 = vpop.eup %655 }
  0xd2   : > { %v658_v44 = vpop.eup %657 }
  0xd3   : > { %v660_v47 = vpop.eup %659 }
  0xe5   : > { %v629_v19 = vpop.f32.mrb[0].mxu1  ;;  %v637_v20 = vpop.f32.mrb[0].mxu0 }
  0xe6   : > { %v397_v22 = vadd.f32 %v637_v20, %v629_v19  ;;  %v294_v23 = vpop.f32.mrb[1].mxu1  ;;  %v391_v24 = vpop.f32.mrb[1].mxu0 }
  0xe7   : > { %v392_v26 = vadd.f32 %v391_v24, %v294_v23 }
  0xe8   : > { %v513_v27 = vsub.f32 %v397_v22, %v509_v21 }
  0xe9   : > { %v512_v30 = vsub.f32 %v392_v26, %v508_v25  ;;  %v632_v31 = vpop.f32.mrb[2].mxu1  ;;  %v640_v32 = vpop.f32.mrb[2].mxu0 }
  0xea   : > { %v517_v35 = vmul.f32 %v654_v28, %v513_v27  ;;  %v407_v36 = vadd.f32 %v640_v32, %v632_v31  ;;  %v304_v37 = vpop.f32.mrb[3].mxu1  ;;  %v401_v38 = vpop.f32.mrb[3].mxu0 }
  0xeb   : > { %v516_v40 = vmul.f32 %v656_v33, %v512_v30  ;;  %v402_v41 = vadd.f32 %v401_v38, %v304_v37 }
  0xec   : > { %v525_v42 = vadd.f32 %v611_v29, %v517_v35  ;;  %v515_v43 = vsub.f32 %v407_v36, %v511_v34 }
  0xed   : > { %v524_v45 = vadd.f32 %v611_v29, %v516_v40  ;;  %v514_v46 = vsub.f32 %v402_v41, %v510_v39 }
  0xee   : > { %529 = vst.msk [vmem:[%s202_s7 + $0x8] sm:$0xff] %vm215_vm0, %v525_v42  ;;  %v519_v48 = vmul.f32 %v658_v44, %v515_v43 }
  0xef   : > { %528 = vst.msk [vmem:[%s202_s7] sm:$0xff] %vm215_vm0, %v524_v45  ;;  %v518_v49 = vmul.f32 %v660_v47, %v514_v46 }
  0xf0   : > { %v527_v50 = vadd.f32 %v611_v29, %v519_v48 }
  0xf1   : > { %v526_v51 = vadd.f32 %v611_v29, %v518_v49 }
  0xf2   : > { %531 = vst.msk [vmem:[%s202_s7 + $0x18] sm:$0xff] %vm215_vm0, %v527_v50 }
  0xf3   : > { %530 = vst.msk [vmem:[%s202_s7 + $0x10] sm:$0xff] %vm215_vm0, %v526_v51 }
  0xf4 PF: > { %s14_s15 = sadd.s32 1, %s667_s15  }
  0xf5   : > { %p11_p4 = scmp.ge.s32.totalorder %s14_s15, 6  }
  0xf7   :  { %13 = sbr.rel (!%p11_p4) target bundleno = 1 (0x1), region = 67 }

</bundles_post_ra>
